<compile_context>
chip_gen: v7x
topology: tpu7x:2x2x1
jax: 0.10.0
libtpu: 0.0.40
codegen_flags: <defaults>
</compile_context>

<pallas_src>
import jax
import jax.numpy as jnp
from jax.experimental import pallas as pl
from jax.experimental.pallas import tpu as pltpu

_IN = 79
_HID = 8
_OUT = 3

# Max rows per batch tile. 16384 * 79 * 4 B ~= 4.9 MiB per buffer; with double
# buffering (+ the tiny output tiles and weights) total VMEM stays ~10.5 MiB,
# safe on v5e/v6e/v7x while amortizing per-grid-step overhead to <10%.
_TB_MAX = 16384


def _net_kernel(x_ref, w1_ref, b1_ref, w2_ref, b2_ref, o_ref):
    # x_ref: (TB, 79), w1_ref: (79, 8), b1_ref: (1, 8),
    # w2_ref: (8, 3),  b2_ref: (1, 3),  o_ref: (TB, 3)
    x = x_ref[...]

    # fc1 + ReLU
    h = jnp.dot(x, w1_ref[...], preferred_element_type=jnp.float32) + b1_ref[...]
    h = jnp.maximum(h, 0.0)

    # fc2
    logits = jnp.dot(h, w2_ref[...], preferred_element_type=jnp.float32) + b2_ref[...]

    # log_softmax over the class axis, numerically stable (max-shifted).
    m = jnp.max(logits, axis=-1, keepdims=True)
    shifted = logits - m
    lse = jnp.log(jnp.sum(jnp.exp(shifted), axis=-1, keepdims=True))
    o_ref[...] = (shifted - lse).astype(o_ref.dtype)


def net_forward(x, w1, b1, w2, b2):
    """Pallas forward pass.

    x  : (..., 79) float32   (the PyTorch module does x.view(-1, 79))
    w1 : (79, 8), b1: (8,)
    w2 : (8, 3),  b2: (3,)
    returns (N, 3) log-probabilities.
    """
    x = x.reshape(-1, _IN).astype(jnp.float32)
    n = x.shape[0]

    # Batch tile size: multiple of 8 (sublane granularity), capped at _TB_MAX.
    tb = min(_TB_MAX, max(8, ((n + 7) // 8) * 8))
    grid = (pl.cdiv(n, tb),)

    # 2-D biases broadcast cleanly inside the kernel.
    b1_2d = b1.reshape(1, _HID).astype(jnp.float32)
    b2_2d = b2.reshape(1, _OUT).astype(jnp.float32)
    w1 = w1.astype(jnp.float32)
    w2 = w2.astype(jnp.float32)

    # Weights/biases: full-array blocks, constant index map -> loaded once,
    # VMEM-resident across all batch tiles.
    const_spec = lambda shape: pl.BlockSpec(shape, lambda i: (0, 0))

    cost = pl.CostEstimate(
        flops=2 * n * (_IN * _HID + _HID * _OUT),
        transcendentals=n * _OUT,  # exp in the softmax
        bytes_accessed=n * (_IN + _OUT) * 4
        + (_IN * _HID + _HID + _HID * _OUT + _OUT) * 4,
    )

    return pl.pallas_call(
        _net_kernel,
        out_shape=jax.ShapeDtypeStruct((n, _OUT), jnp.float32),
        grid=grid,
        in_specs=[
            pl.BlockSpec((tb, _IN), lambda i: (i, 0)),      # x: streamed tiles
            const_spec((_IN, _HID)),                        # w1
            const_spec((1, _HID)),                          # b1
            const_spec((_HID, _OUT)),                       # w2
            const_spec((1, _OUT)),                          # b2
        ],
        out_specs=pl.BlockSpec((tb, _OUT), lambda i: (i, 0)),
        compiler_params=pltpu.CompilerParams(
            dimension_semantics=("parallel",),
            vmem_limit_bytes=32 * 1024 * 1024,
        ),
        cost_estimate=cost,
    )(x, w1, b1_2d, w2, b2_2d)


def init_params(key):
    """Deterministic init mimicking PyTorch's default Linear init:
    U(-1/sqrt(fan_in), 1/sqrt(fan_in)) for both weights and biases."""
    k1, k2, k3, k4 = jax.random.split(key, 4)
    bound1 = 1.0 / jnp.sqrt(float(_IN))
    bound2 = 1.0 / jnp.sqrt(float(_HID))
    w1 = jax.random.uniform(k1, (_IN, _HID), jnp.float32, -bound1, bound1)
    b1 = jax.random.uniform(k2, (_HID,), jnp.float32, -bound1, bound1)
    w2 = jax.random.uniform(k3, (_HID, _OUT), jnp.float32, -bound2, bound2)
    b2 = jax.random.uniform(k4, (_OUT,), jnp.float32, -bound2, bound2)
    return w1, b1, w2, b2


def _reference(x, w1, b1, w2, b2):
    x = x.reshape(-1, _IN).astype(jnp.float32)
    h = jnp.maximum(x @ w1 + b1, 0.0)
    logits = h @ w2 + b2
    return jax.nn.log_softmax(logits, axis=-1)


if __name__ == "__main__":
    key = jax.random.PRNGKey(0)
    k_params, k_x = jax.random.split(key)

    w1, b1, w2, b2 = init_params(k_params)

    # Small deterministic example input: batch=8, features=79.
    x = jax.random.normal(k_x, (8, _IN), jnp.float32)

    out = net_forward(x, w1, b1, w2, b2)
    out = jax.block_until_ready(out)

    # Sanity: shape, matches pure-JAX reference, and rows exponentiate to 1.
    ref = _reference(x, w1, b1, w2, b2)
    assert out.shape == (8, _OUT)
    assert bool(jnp.all(jnp.abs(out - ref) < 1e-5))
    row_sums = jnp.sum(jnp.exp(out), axis=1)
    assert bool(jnp.all(jnp.abs(row_sums - 1.0) < 1e-5))

    print("KERNEL_OK")
</pallas_src>

<mosaic_0001>
module attributes {stable_mosaic.version = 11 : i64} {
  func.func @_net_kernel(%arg0: i32, %arg1: memref<8x79xf32, #tpu.memory_space<vmem>>, %arg2: memref<79x8xf32, #tpu.memory_space<vmem>>, %arg3: memref<1x8xf32, #tpu.memory_space<vmem>>, %arg4: memref<8x3xf32, #tpu.memory_space<vmem>>, %arg5: memref<1x3xf32, #tpu.memory_space<vmem>>, %arg6: memref<8x3xf32, #tpu.memory_space<vmem>>) attributes {dimension_semantics = [#tpu.dimension_semantics<parallel>], iteration_bounds = array<i64: 1>, scalar_prefetch = 0 : i64, scratch_operands = 0 : i64, tpu.core_type = #tpu.core_type<tc>, window_params = [{transform_indices = @transform_0, window_bounds = array<i64: 8, 79>}, {pipeline_mode = #tpu.pipeline_mode<synchronous>, transform_indices = @transform_1, window_bounds = array<i64: 79, 8>}, {pipeline_mode = #tpu.pipeline_mode<synchronous>, transform_indices = @transform_2, window_bounds = array<i64: 1, 8>}, {pipeline_mode = #tpu.pipeline_mode<synchronous>, transform_indices = @transform_3, window_bounds = array<i64: 8, 3>}, {pipeline_mode = #tpu.pipeline_mode<synchronous>, transform_indices = @transform_4, window_bounds = array<i64: 1, 3>}, {transform_indices = @transform_5, window_bounds = array<i64: 8, 3>}]} {
    %c0 = arith.constant 0 : index
    %c0_0 = arith.constant 0 : index
    %0 = vector.load %arg1[%c0, %c0_0] : memref<8x79xf32, #tpu.memory_space<vmem>>, vector<8x79xf32>
    %c0_1 = arith.constant 0 : index
    %c0_2 = arith.constant 0 : index
    %1 = vector.load %arg2[%c0_1, %c0_2] : memref<79x8xf32, #tpu.memory_space<vmem>>, vector<79x8xf32>
    %cst = arith.constant dense<0.000000e+00> : vector<8x8xf32>
    %2 = tpu.matmul %0, %1, %cst {dimension_numbers = #tpu.dot_dimension_numbers<[1], [0], [0], [1], [0, 0, 1, 1], [], []>} : vector<8x79xf32>, vector<79x8xf32>, vector<8x8xf32> -> vector<8x8xf32>
    %c0_3 = arith.constant 0 : index
    %c0_4 = arith.constant 0 : index
    %3 = vector.load %arg3[%c0_3, %c0_4] : memref<1x8xf32, #tpu.memory_space<vmem>>, vector<1x8xf32>
    %4 = vector.broadcast %3 : vector<1x8xf32> to vector<8x8xf32>
    %5 = arith.addf %2, %4 : vector<8x8xf32>
    %cst_5 = arith.constant 0.000000e+00 : f32
    %6 = vector.broadcast %cst_5 : f32 to vector<8x8xf32>
    %7 = arith.maximumf %5, %6 : vector<8x8xf32>
    %c0_6 = arith.constant 0 : index
    %c0_7 = arith.constant 0 : index
    %8 = vector.load %arg4[%c0_6, %c0_7] : memref<8x3xf32, #tpu.memory_space<vmem>>, vector<8x3xf32>
    %cst_8 = arith.constant dense<0.000000e+00> : vector<8x3xf32>
    %9 = tpu.matmul %7, %8, %cst_8 {dimension_numbers = #tpu.dot_dimension_numbers<[1], [0], [0], [1], [0, 0, 1, 1], [], []>} : vector<8x8xf32>, vector<8x3xf32>, vector<8x3xf32> -> vector<8x3xf32>
    %c0_9 = arith.constant 0 : index
    %c0_10 = arith.constant 0 : index
    %10 = vector.load %arg5[%c0_9, %c0_10] : memref<1x3xf32, #tpu.memory_space<vmem>>, vector<1x3xf32>
    %11 = vector.broadcast %10 : vector<1x3xf32> to vector<8x3xf32>
    %12 = arith.addf %9, %11 : vector<8x3xf32>
    %cst_11 = arith.constant dense<0xFF800000> : vector<8xf32>
    %13 = vector.multi_reduction <maximumf>, %12, %cst_11 [1] : vector<8x3xf32> to vector<8xf32>
    %14 = vector.shape_cast %13 : vector<8xf32> to vector<8x1xf32>
    %15 = vector.broadcast %14 : vector<8x1xf32> to vector<8x3xf32>
    %16 = arith.subf %12, %15 : vector<8x3xf32>
    %17 = math.exp %16 : vector<8x3xf32>
    %cst_12 = arith.constant dense<0.000000e+00> : vector<8xf32>
    %18 = vector.multi_reduction <add>, %17, %cst_12 [1] : vector<8x3xf32> to vector<8xf32>
    %19 = vector.shape_cast %18 : vector<8xf32> to vector<8x1xf32>
    %20 = math.log %19 : vector<8x1xf32>
    %21 = vector.broadcast %20 : vector<8x1xf32> to vector<8x3xf32>
    %22 = arith.subf %16, %21 : vector<8x3xf32>
    %c0_13 = arith.constant 0 : index
    %c0_14 = arith.constant 0 : index
    %23 = vector.load %arg6[%c0_13, %c0_14] : memref<8x3xf32, #tpu.memory_space<vmem>>, vector<8x3xf32>
    tpu.vector_store %arg6[%c0_13, %c0_14], %22 {strides = array<i32>} : memref<8x3xf32, #tpu.memory_space<vmem>>, vector<8x3xf32>,
    return
  }
  func.func @transform_0(%arg0: i32) -> (i32, i32) {
    %c0_i32 = arith.constant 0 : i32
    %c0_i32_0 = arith.constant 0 : i32
    return %arg0, %c0_i32 : i32, i32
  }
  func.func @transform_1(%arg0: i32) -> (i32, i32) {
    %c0_i32 = arith.constant 0 : i32
    %c0_i32_0 = arith.constant 0 : i32
    %c0_i32_1 = arith.constant 0 : i32
    return %c0_i32, %c0_i32_0 : i32, i32
  }
  func.func @transform_2(%arg0: i32) -> (i32, i32) {
    %c0_i32 = arith.constant 0 : i32
    %c0_i32_0 = arith.constant 0 : i32
    %c0_i32_1 = arith.constant 0 : i32
    return %c0_i32, %c0_i32_0 : i32, i32
  }
  func.func @transform_3(%arg0: i32) -> (i32, i32) {
    %c0_i32 = arith.constant 0 : i32
    %c0_i32_0 = arith.constant 0 : i32
    %c0_i32_1 = arith.constant 0 : i32
    return %c0_i32, %c0_i32_0 : i32, i32
  }
  func.func @transform_4(%arg0: i32) -> (i32, i32) {
    %c0_i32 = arith.constant 0 : i32
    %c0_i32_0 = arith.constant 0 : i32
    %c0_i32_1 = arith.constant 0 : i32
    return %c0_i32, %c0_i32_0 : i32, i32
  }
  func.func @transform_5(%arg0: i32) -> (i32, i32) {
    %c0_i32 = arith.constant 0 : i32
    %c0_i32_0 = arith.constant 0 : i32
    return %arg0, %c0_i32 : i32, i32
  }
}

</mosaic_0001>

<bundles_post_ra>
// kernel: tpu_custom_call.1
= control target key start
LH: loop header
LB: loop body
LE: loop exit
PB: predicated region body
PF: predicated region fallthrough
CT: control target
= control target key end

     0   :  { %v287_v0 = vmov 0.0|0.0   ;;  %vm288_vm0 = vmmov 0   ;;  %v289_v6 = vmov 0.0   ;;  %vm42_vm1 = vcmask 1046528   ;;  %s369_s1 = inlined_call_operand.vmem [shape: f32[79,8], index: 1, kind: input, shape index: {}]   ;;  %s370_s0 = inlined_call_operand.vmem [shape: f32[8,79], index: 0, kind: input, shape index: {}]   ;;  %s371_s3 = inlined_call_operand.vmem [shape: f32[8,3], index: 3, kind: input, shape index: {}]   ;;  %s372_s2 = inlined_call_operand.vmem [shape: f32[1,8], index: 2, kind: input, shape index: {}]   ;;  %s373_s4 = inlined_call_operand.vmem [shape: f32[1,3], index: 4, kind: input, shape index: {}]   ;;  %s374_s5 = inlined_call_operand.vmem [shape: f32[8,3], index: 5, kind: output, shape index: {}]  }
   0x1   :  { %263 = vmatprep.subr.bf16.mxu0 %v287_v0  ;;  %v21_v1 = vld [vmem:[%s369_s1] sm:$0xff]  ;;  %v22_v2 = vld [vmem:[%s369_s1 + $0x8] sm:$0xff]  ;;  %v23_v3 = vld [vmem:[%s369_s1 + $0x10] sm:$0xff]  ;;  %255 = vmatprep.mubr.msk.f32.mxu0 %vm288_vm0, %v289_v6  ;;  %vm290_vm2 = vmmov 1   ;;  %vm38_vm4 = vcmask 646144   ;;  %vm125_vm5 = vcmask 64512  }
   0x2   :  { %v264_v4 = vpack.c.bf16 %v22_v2, %v21_v1  ;;  %v24_v5 = vld [vmem:[%s369_s1 + $0x18] sm:$0xff]  ;;  %258 = vmatprep.subr.mxu1 %v289_v6  ;;  %260 = vmatprep.mubr.msk.f32.mxu1 %vm288_vm0, %v289_v6  ;;  %v25_v8 = vld [vmem:[%s369_s1 + $0x20] sm:$0xff]  ;;  %v26_v9 = vld [vmem:[%s369_s1 + $0x28] sm:$0xff]  ;;  %vm199_vm6 = vcmask 23552  }
   0x3   :  { %v267_v7 = vpack.c.bf16 %v24_v5, %v23_v3  ;;  %v270_v10 = vpack.c.bf16 %v26_v9, %v25_v8  ;;  %v27_v11 = vld [vmem:[%s369_s1 + $0x30] sm:$0xff]  ;;  %v28_v12 = vld [vmem:[%s369_s1 + $0x38] sm:$0xff]  ;;  %v29_v14 = vld [vmem:[%s369_s1 + $0x40] sm:$0xff] }
   0x4   :  { %265 = vmatpush3.bf16.msra.mxu0 %v264_v4  ;;  %v273_v13 = vpack.c.bf16 %v28_v12, %v27_v11  ;;  %v30_v15 = vld [vmem:[%s369_s1 + $0x48] sm:$0x7f]  ;;  %vm277_vm3 = vmpackc.low %vm42_vm1, %vm290_vm2  ;;  %v20_v17 = vld [vmem:[%s370_s0] sm:$0xff] }
   0x5   :  { %266 = vmatprep.subr.bf16.mxu0 %v287_v0  ;;  %v276_v16 = vpack.c.bf16 %v30_v15, %v29_v14  ;;  %v117_v18 = vld [vmem:[%s371_s3] sm:$0xff] }
   0x6   :  { %259 = vmatpush3.msra.mxu1 %v117_v18  ;;  %v217_v19 = vld [vmem:[%s372_s2] ss:$0 sm:$0xff] }
   0x7   :  { %v220_v24 = vld [vmem:[%s373_s4] ss:$0 sm:$0xff] }
   0x8   :  { %268 = vmatpush3.bf16.msra.mxu0 %v267_v7 }
   0x9   :  { %269 = vmatprep.subr.bf16.mxu0 %v287_v0 }
   0xc   :  { %271 = vmatpush3.bf16.msra.mxu0 %v270_v10 }
   0xd   :  { %272 = vmatprep.subr.bf16.mxu0 %v287_v0 }
  0x10   :  { %274 = vmatpush3.bf16.msra.mxu0 %v273_v13 }
  0x11   :  { %275 = vmatprep.subr.bf16.mxu0 %v287_v0 }
  0x14   :  { %278 = vmatpush3.bf16.msk.msra.mxu0 %vm277_vm3, %v276_v16 }
  0x17   :  { %256 = vmatmul.mubr.msk.f32.vlgmr.msra.gmra.mrb[0].mxu0 %vm38_vm4, %v20_v17 }
  0xea   :  { %v112_v20 = vpop.f32.mrb[0].mxu0 }
  0xeb   :  { %v113_v21 = vadd.f32 %v217_v19, %v112_v20  ;;  %v257_v22 = vpop.f32.mrb[1].mxu0 }
  0xed   :  { %v116_v23 = vmax.f32 %v113_v21, 0.0 }
  0xef   :  { %261 = vmatmul.mubr.msk.f32.vlgmr.msra.gmra.mrb[0].mxu1 %vm125_vm5, %v116_v23 }
 0x1c2   :  { %v195_v25 = vpop.f32.mrb[0].mxu1 }
 0x1c3   :  { %v196_v26 = vadd.f32 %v220_v24, %v195_v25  ;;  %v262_v27 = vpop.f32.mrb[1].mxu1 }
 0x1c5   :  { %v200_v28 = vsel %vm199_vm6, %v196_v26, -inf }
 0x1c6   :  { %201 = vmax.xlane.f32.xlu0 %v200_v28 }
 0x253   :  { %v202_v29 = vpop.xlane.xlu0 %201 }
 0x254   :  { %v203_v30 = vsub.f32 %v196_v26, %v202_v29 }
 0x256   :  { %v204_v31 = vmul.f32 1.442695, %v203_v30 }
 0x258   :  { %283 = vpow2.f32 %v204_v31 }
 0x262   :  { %v284_v32 = vpop.eup %283 }
 0x263   :  { %v206_v33 = vsel %vm199_vm6, %v284_v32, 0.0 }
 0x264   :  { %207 = vadd.xlane.f32.xlu0 %v206_v33 }
 0x2f1   :  { %v208_v34 = vpop.xlane.xlu0 %207 }
 0x2f2   :  { %285 = vlog2.f32 %v208_v34 }
 0x2fc   :  { %v286_v35 = vpop.eup %285 }
 0x2fd   :  { %v210_v36 = vmul.f32 0.6931472, %v286_v35 }
 0x2ff   :  { %v211_v37 = vsub.f32 %v203_v30, %v210_v36 }
 0x301   :  { %212 = vst.msk [vmem:[%s374_s5] sm:$0xff] %vm199_vm6, %v211_v37 }

</bundles_post_ra>
